<compile_context>
chip_gen: v5e
topology: v5e:2x2
jax: 0.10.0
libtpu: 0.0.40
codegen_flags: <defaults>
</compile_context>

<pallas_src>
import functools

import jax
import jax.numpy as jnp
import numpy as np
from jax.experimental import pallas as pl
from jax.experimental.pallas import tpu as pltpu

K = 5          # conv & pool kernel size
PAD = 2        # conv & pool padding
STRIDE = 2     # pool stride
BN_EPS = 1e-5
NEG = -1e30    # sentinel for pool padding (tanh outputs are in (-1, 1))


# ----------------------------------------------------------------------------
# Pass 1: Conv2d(k=5, pad=2) + bias, lane-dense output, accumulate BN moments.
# ----------------------------------------------------------------------------
def _conv_moments_kernel(xp_ref, w_ref, b_ref, conv_ref, mom_ref):
    # xp_ref   : (1, Hp, Wp*Cin)    lane-dense zero-padded input, one image
    # w_ref    : (K, Wp*Cin, W*Cout) block-Toeplitz conv weights (one per kh)
    # b_ref    : (1, W*Cout)        conv bias tiled per (w, c) lane
    # conv_ref : (H, W*Cout)        conv+bias output for this image (lane-dense)
    # mom_ref  : (2, W*Cout)        accumulator: [per-lane sum; per-lane sumsq]
    hp = xp_ref.shape[1]
    h = hp - 2 * PAD
    wc = w_ref.shape[-1]

    xp = xp_ref[0]                                         # (Hp, Wp*Cin)

    # K accumulated MXU matmuls; output lanes = W*Cout (dense MXU tile).
    # f32 operands kept on purpose (bf16 would exceed the 1e-3 tolerance);
    # on v7x the MRB makes this kh-accumulation effectively free.
    acc = jnp.zeros((h, wc), jnp.float32)
    for kh in range(K):
        acc = acc + jnp.dot(xp[kh:kh + h, :], w_ref[kh],
                            preferred_element_type=jnp.float32)
    y = acc + b_ref[...]                                   # (H, W*Cout)
    conv_ref[...] = y                                      # dense 128-lane store

    # One-pass moments (sum & sumsq) for the 2-pass batch norm.
    upd = jnp.concatenate([jnp.sum(y, axis=0, keepdims=True),
                           jnp.sum(y * y, axis=0, keepdims=True)], axis=0)

    @pl.when(pl.program_id(0) == 0)
    def _init():
        mom_ref[...] = jnp.zeros_like(mom_ref)

    mom_ref[...] = mom_ref[...] + upd


# ----------------------------------------------------------------------------
# Pass 2: finalize BN stats, tanh, MaxPool2d(k=5, s=2, p=2), dense store.
# ----------------------------------------------------------------------------
def _bn_tanh_pool_kernel(conv_ref, mom_ref, o_ref, *, inv_nhw, cout):
    # conv_ref : (H, W*Cout)  conv output for one image (lane-dense)
    # mom_ref  : (2, W*Cout)  global [sum; sumsq] over (N, H) per (w, c) lane
    # o_ref    : (1, rows, 128) packed pooled output  (or (1, Ho, Wo*Cout))
    h, wc = conv_ref.shape
    w = wc // cout
    ho = (h + 2 * PAD - K) // STRIDE + 1
    wo = (w + 2 * PAD - K) // STRIDE + 1

    # Finalize per-channel mean / inv-std (tiny; recomputed per grid step).
    mom = mom_ref[...]
    sum_c = jnp.sum(mom[0:1, :].reshape(w, cout), axis=0, keepdims=True)
    sq_c = jnp.sum(mom[1:2, :].reshape(w, cout), axis=0, keepdims=True)
    mean_c = sum_c * inv_nhw
    var_c = sq_c * inv_nhw - mean_c * mean_c               # biased (training) var
    inv_std_c = jax.lax.rsqrt(var_c + BN_EPS)
    mean_l = jnp.broadcast_to(mean_c, (w, cout)).reshape(1, wc)
    inv_std_l = jnp.broadcast_to(inv_std_c, (w, cout)).reshape(1, wc)

    # BatchNorm (gamma=1, beta=0) + Tanh
    act = jnp.tanh((conv_ref[...] - mean_l) * inv_std_l)   # (H, W*Cout)

    # MaxPool2d(k=5, stride=2, pad=2), separable; all intermediates keep the
    # fixed W*Cout lane width (no widened padded slab).
    # rows (sublane axis): max over shifts -2..2 with a sentinel fill
    rowmax = act
    for s in (-2, -1, 1, 2):
        if s > 0:
            sh = jnp.concatenate(
                [act[s:, :], jnp.full((s, wc), NEG, jnp.float32)], axis=0)
        else:
            sh = jnp.concatenate(
                [jnp.full((-s, wc), NEG, jnp.float32), act[:h + s, :]], axis=0)
        rowmax = jnp.maximum(rowmax, sh)
    rowp = rowmax.reshape(ho, STRIDE, wc)[:, 0, :]          # keep even rows

    # cols (lane axis; lane = w*Cout + c, so a shift of s cols = s*Cout lanes)
    colmax = rowp
    for s in (-2, -1, 1, 2):
        d = s * cout
        if s > 0:
            sh = jnp.concatenate(
                [rowp[:, d:], jnp.full((ho, d), NEG, jnp.float32)], axis=1)
        else:
            sh = jnp.concatenate(
                [jnp.full((ho, -d), NEG, jnp.float32), rowp[:, :wc + d]], axis=1)
        colmax = jnp.maximum(colmax, sh)
    pooled = colmax.reshape(ho, wo, STRIDE * cout)[:, :, :cout]  # keep even cols

    # Single dense store; when Ho*Wo*Cout % 128 == 0 the output block is a
    # 128-lane packed slab (unmasked vst).
    o_ref[...] = pooled.reshape(o_ref.shape)


# ----------------------------------------------------------------------------
# Wrapper: layout plumbing only (transpose/pad/Toeplitz build/unflatten).
# ----------------------------------------------------------------------------
def _toeplitz_weights(w_hwio, w_spatial):
    """(K, K, Cin, Cout) -> (K, Wp*Cin, W*Cout) block-Toeplitz conv weights.

    T[kh][(col+kw)*Cin + ci, col*Cout + co] = w_hwio[kh, kw, ci, co], else 0.
    """
    kh_n, kw_n, cin, cout = w_hwio.shape
    wp = w_spatial + 2 * PAD
    mats = []
    for kh in range(kh_n):
        base = w_hwio[kh].reshape(kw_n * cin, cout)         # row = kw*Cin + ci
        cols = [jnp.pad(base, ((col * cin, (wp - kw_n - col) * cin), (0, 0)))
                for col in range(w_spatial)]
        mats.append(jnp.stack(cols, axis=1).reshape(wp * cin, w_spatial * cout))
    return jnp.stack(mats, axis=0).astype(jnp.float32)


def block_type1(x_nchw, w_hwio, bias):
    """Forward pass of BlockType1. x_nchw: (N, Cin, H, W) float32; returns NCHW."""
    n, cin, h, w = x_nchw.shape
    cout = w_hwio.shape[-1]
    assert h % STRIDE == 0 and w % STRIDE == 0, "kernel assumes even spatial dims"
    hp, wp = h + 2 * PAD, w + 2 * PAD
    ho = (h + 2 * PAD - K) // STRIDE + 1
    wo = (w + 2 * PAD - K) // STRIDE + 1
    wc, wpc = w * cout, wp * cin

    # Layout plumbing stays in plain JAX; all compute happens inside the kernels.
    x_nhwc = jnp.transpose(x_nchw, (0, 2, 3, 1)).astype(jnp.float32)
    x_lane = jnp.pad(
        x_nhwc, ((0, 0), (PAD, PAD), (PAD, PAD), (0, 0))).reshape(n, hp, wpc)
    w_toep = _toeplitz_weights(w_hwio.astype(jnp.float32), w)   # (K, Wp*Cin, W*Cout)
    b_lane = jnp.tile(bias.astype(jnp.float32), w).reshape(1, wc)

    # ---- pass 1: conv (+bias) per image; accumulate BN sum/sumsq across grid
    conv_slab, moments = pl.pallas_call(
        _conv_moments_kernel,
        grid=(n,),
        in_specs=[
            pl.BlockSpec((1, hp, wpc), lambda i: (i, 0, 0)),
            pl.BlockSpec((K, wpc, wc), lambda i: (0, 0, 0)),   # resident weights
            pl.BlockSpec((1, wc), lambda i: (0, 0)),
        ],
        out_specs=(
            pl.BlockSpec((h, wc), lambda i: (i, 0)),
            pl.BlockSpec((2, wc), lambda i: (0, 0)),           # moment accumulator
        ),
        out_shape=(
            jax.ShapeDtypeStruct((n * h, wc), jnp.float32),
            jax.ShapeDtypeStruct((2, wc), jnp.float32),
        ),
        compiler_params=pltpu.CompilerParams(
            dimension_semantics=("arbitrary",)),               # sequential: accumulator
    )(x_lane, w_toep, b_lane)

    # ---- pass 2: finalize BN, tanh, maxpool; megacore-parallel over images
    pack = (ho * wo * cout) % 128 == 0
    if pack:
        rows = (ho * wo * cout) // 128
        out_shape = jax.ShapeDtypeStruct((n, rows, 128), jnp.float32)
        out_spec = pl.BlockSpec((1, rows, 128), lambda i: (i, 0, 0))
    else:
        out_shape = jax.ShapeDtypeStruct((n, ho, wo * cout), jnp.float32)
        out_spec = pl.BlockSpec((1, ho, wo * cout), lambda i: (i, 0, 0))

    pooled = pl.pallas_call(
        functools.partial(_bn_tanh_pool_kernel,
                          inv_nhw=1.0 / float(n * h * w), cout=cout),
        grid=(n,),
        in_specs=[
            pl.BlockSpec((h, wc), lambda i: (i, 0)),
            pl.BlockSpec((2, wc), lambda i: (0, 0)),
        ],
        out_specs=out_spec,
        out_shape=out_shape,
        compiler_params=pltpu.CompilerParams(
            dimension_semantics=("parallel",)),
    )(conv_slab, moments)

    out = pooled.reshape(n, ho, wo, cout)
    return jnp.transpose(out, (0, 3, 1, 2))                    # back to NCHW


# ----------------------------------------------------------------------------
# Pure-JAX reference identical to the PyTorch module (training-mode BN).
# ----------------------------------------------------------------------------
def ref_forward(x_nchw, w_hwio, bias):
    w_oihw = jnp.transpose(w_hwio, (3, 2, 0, 1))
    y = jax.lax.conv_general_dilated(
        x_nchw, w_oihw, window_strides=(1, 1),
        padding=((PAD, PAD), (PAD, PAD)),
        dimension_numbers=("NCHW", "OIHW", "NCHW"),
        precision=jax.lax.Precision.HIGHEST)
    y = y + bias[None, :, None, None]
    mean = jnp.mean(y, axis=(0, 2, 3), keepdims=True)
    var = jnp.mean((y - mean) ** 2, axis=(0, 2, 3), keepdims=True)
    y = (y - mean) / jnp.sqrt(var + BN_EPS)
    y = jnp.tanh(y)
    y = jax.lax.reduce_window(
        y, -jnp.inf, jax.lax.max,
        window_dimensions=(1, 1, K, K),
        window_strides=(1, 1, STRIDE, STRIDE),
        padding=((0, 0), (0, 0), (PAD, PAD), (PAD, PAD)))
    return y


if __name__ == "__main__":
    key = jax.random.PRNGKey(0)
    kx, kw, kb = jax.random.split(key, 3)

    N, Cin, Cout, H, W = 2, 4, 8, 16, 16
    x = jax.random.normal(kx, (N, Cin, H, W), dtype=jnp.float32)
    # deterministic synthetic parameters (shapes from nn.Conv2d(cin, cout, 5, padding=2))
    w_hwio = 0.1 * jax.random.normal(kw, (K, K, Cin, Cout), dtype=jnp.float32)
    bias = 0.1 * jax.random.normal(kb, (Cout,), dtype=jnp.float32)

    out = block_type1(x, w_hwio, bias)
    out = jax.block_until_ready(out)

    ref = ref_forward(x, w_hwio, bias)
    np.testing.assert_allclose(np.asarray(out), np.asarray(ref),
                               atol=1e-3, rtol=1e-3)
    print("KERNEL_OK")
</pallas_src>

<mosaic_0001>
module attributes {stable_mosaic.version = 11 : i64} {
  func.func @_conv_moments_kernel(%arg0: i32, %arg1: memref<1x20x80xf32, #tpu.memory_space<vmem>>, %arg2: memref<5x80x128xf32, #tpu.memory_space<vmem>>, %arg3: memref<1x128xf32, #tpu.memory_space<vmem>>, %arg4: memref<16x128xf32, #tpu.memory_space<vmem>>, %arg5: memref<2x128xf32, #tpu.memory_space<vmem>>) attributes {dimension_semantics = [#tpu.dimension_semantics<arbitrary>], iteration_bounds = array<i64: 2>, scalar_prefetch = 0 : i64, scratch_operands = 0 : i64, tpu.core_type = #tpu.core_type<tc>, window_params = [{transform_indices = @transform_0, window_bounds = array<i64: 1, 20, 80>}, {pipeline_mode = #tpu.pipeline_mode<synchronous>, transform_indices = @transform_1, window_bounds = array<i64: 5, 80, 128>}, {pipeline_mode = #tpu.pipeline_mode<synchronous>, transform_indices = @transform_2, window_bounds = array<i64: 1, 128>}, {transform_indices = @transform_3, window_bounds = array<i64: 16, 128>}, {pipeline_mode = #tpu.pipeline_mode<synchronous>, transform_indices = @transform_4, window_bounds = array<i64: 2, 128>}]} {
    %c0 = arith.constant 0 : index
    %c0_0 = arith.constant 0 : index
    %c0_1 = arith.constant 0 : index
    %0 = vector.load %arg1[%c0, %c0_0, %c0_1] : memref<1x20x80xf32, #tpu.memory_space<vmem>>, vector<1x20x80xf32>
    %1 = vector.shape_cast %0 : vector<1x20x80xf32> to vector<20x80xf32>
    %cst = arith.constant 0.000000e+00 : f32
    %2 = vector.broadcast %cst : f32 to vector<16x128xf32>
    %3 = vector.extract_strided_slice %1 {offsets = [0, 0], sizes = [16, 80], strides = [1, 1]} : vector<20x80xf32> to vector<16x80xf32>
    %c0_2 = arith.constant 0 : index
    %c0_3 = arith.constant 0 : index
    %c0_4 = arith.constant 0 : index
    %4 = vector.load %arg2[%c0_2, %c0_3, %c0_4] : memref<5x80x128xf32, #tpu.memory_space<vmem>>, vector<1x80x128xf32>
    %5 = vector.shape_cast %4 : vector<1x80x128xf32> to vector<80x128xf32>
    %cst_5 = arith.constant dense<0.000000e+00> : vector<16x128xf32>
    %6 = tpu.matmul %3, %5, %cst_5 {dimension_numbers = #tpu.dot_dimension_numbers<[1], [0], [0], [1], [0, 0, 1, 1], [], []>} : vector<16x80xf32>, vector<80x128xf32>, vector<16x128xf32> -> vector<16x128xf32>
    %7 = arith.addf %2, %6 : vector<16x128xf32>
    %8 = vector.extract_strided_slice %1 {offsets = [1, 0], sizes = [16, 80], strides = [1, 1]} : vector<20x80xf32> to vector<16x80xf32>
    %c1 = arith.constant 1 : index
    %c0_6 = arith.constant 0 : index
    %c0_7 = arith.constant 0 : index
    %9 = vector.load %arg2[%c1, %c0_6, %c0_7] : memref<5x80x128xf32, #tpu.memory_space<vmem>>, vector<1x80x128xf32>
    %10 = vector.shape_cast %9 : vector<1x80x128xf32> to vector<80x128xf32>
    %cst_8 = arith.constant dense<0.000000e+00> : vector<16x128xf32>
    %11 = tpu.matmul %8, %10, %cst_8 {dimension_numbers = #tpu.dot_dimension_numbers<[1], [0], [0], [1], [0, 0, 1, 1], [], []>} : vector<16x80xf32>, vector<80x128xf32>, vector<16x128xf32> -> vector<16x128xf32>
    %12 = arith.addf %7, %11 : vector<16x128xf32>
    %13 = vector.extract_strided_slice %1 {offsets = [2, 0], sizes = [16, 80], strides = [1, 1]} : vector<20x80xf32> to vector<16x80xf32>
    %c2 = arith.constant 2 : index
    %c0_9 = arith.constant 0 : index
    %c0_10 = arith.constant 0 : index
    %14 = vector.load %arg2[%c2, %c0_9, %c0_10] : memref<5x80x128xf32, #tpu.memory_space<vmem>>, vector<1x80x128xf32>
    %15 = vector.shape_cast %14 : vector<1x80x128xf32> to vector<80x128xf32>
    %cst_11 = arith.constant dense<0.000000e+00> : vector<16x128xf32>
    %16 = tpu.matmul %13, %15, %cst_11 {dimension_numbers = #tpu.dot_dimension_numbers<[1], [0], [0], [1], [0, 0, 1, 1], [], []>} : vector<16x80xf32>, vector<80x128xf32>, vector<16x128xf32> -> vector<16x128xf32>
    %17 = arith.addf %12, %16 : vector<16x128xf32>
    %18 = vector.extract_strided_slice %1 {offsets = [3, 0], sizes = [16, 80], strides = [1, 1]} : vector<20x80xf32> to vector<16x80xf32>
    %c3 = arith.constant 3 : index
    %c0_12 = arith.constant 0 : index
    %c0_13 = arith.constant 0 : index
    %19 = vector.load %arg2[%c3, %c0_12, %c0_13] : memref<5x80x128xf32, #tpu.memory_space<vmem>>, vector<1x80x128xf32>
    %20 = vector.shape_cast %19 : vector<1x80x128xf32> to vector<80x128xf32>
    %cst_14 = arith.constant dense<0.000000e+00> : vector<16x128xf32>
    %21 = tpu.matmul %18, %20, %cst_14 {dimension_numbers = #tpu.dot_dimension_numbers<[1], [0], [0], [1], [0, 0, 1, 1], [], []>} : vector<16x80xf32>, vector<80x128xf32>, vector<16x128xf32> -> vector<16x128xf32>
    %22 = arith.addf %17, %21 : vector<16x128xf32>
    %23 = vector.extract_strided_slice %1 {offsets = [4, 0], sizes = [16, 80], strides = [1, 1]} : vector<20x80xf32> to vector<16x80xf32>
    %c4 = arith.constant 4 : index
    %c0_15 = arith.constant 0 : index
    %c0_16 = arith.constant 0 : index
    %24 = vector.load %arg2[%c4, %c0_15, %c0_16] : memref<5x80x128xf32, #tpu.memory_space<vmem>>, vector<1x80x128xf32>
    %25 = vector.shape_cast %24 : vector<1x80x128xf32> to vector<80x128xf32>
    %cst_17 = arith.constant dense<0.000000e+00> : vector<16x128xf32>
    %26 = tpu.matmul %23, %25, %cst_17 {dimension_numbers = #tpu.dot_dimension_numbers<[1], [0], [0], [1], [0, 0, 1, 1], [], []>} : vector<16x80xf32>, vector<80x128xf32>, vector<16x128xf32> -> vector<16x128xf32>
    %27 = arith.addf %22, %26 : vector<16x128xf32>
    %c0_18 = arith.constant 0 : index
    %c0_19 = arith.constant 0 : index
    %28 = vector.load %arg3[%c0_18, %c0_19] : memref<1x128xf32, #tpu.memory_space<vmem>>, vector<1x128xf32>
    %29 = vector.broadcast %28 : vector<1x128xf32> to vector<16x128xf32>
    %30 = arith.addf %27, %29 : vector<16x128xf32>
    %c0_20 = arith.constant 0 : index
    %c0_21 = arith.constant 0 : index
    %31 = vector.load %arg4[%c0_20, %c0_21] : memref<16x128xf32, #tpu.memory_space<vmem>>, vector<16x128xf32>
    tpu.vector_store %arg4[%c0_20, %c0_21], %30 {strides = array<i32>} : memref<16x128xf32, #tpu.memory_space<vmem>>, vector<16x128xf32>,
    %cst_22 = arith.constant dense<0.000000e+00> : vector<128xf32>
    %32 = vector.multi_reduction <add>, %30, %cst_22 [0] : vector<16x128xf32> to vector<128xf32>
    %33 = vector.shape_cast %32 : vector<128xf32> to vector<1x128xf32>
    %34 = arith.mulf %30, %30 : vector<16x128xf32>
    %cst_23 = arith.constant dense<0.000000e+00> : vector<128xf32>
    %35 = vector.multi_reduction <add>, %34, %cst_23 [0] : vector<16x128xf32> to vector<128xf32>
    %36 = vector.shape_cast %35 : vector<128xf32> to vector<1x128xf32>
    %37 = tpu.concatenate %33, %36 in 0 : vector<1x128xf32>, vector<1x128xf32> -> vector<2x128xf32>
    %c0_i32 = arith.constant 0 : i32
    %38 = arith.cmpi eq, %arg0, %c0_i32 : i32
    %39 = arith.extui %38 : i1 to i32
    %c0_i32_24 = arith.constant 0 : i32
    %40 = arith.cmpi ne, %39, %c0_i32_24 : i32
    scf.if %40 {
      %cst_29 = arith.constant 0.000000e+00 : f32
      %44 = vector.broadcast %cst_29 : f32 to vector<2x128xf32>
      %c0_30 = arith.constant 0 : index
      %c0_31 = arith.constant 0 : index
      %45 = vector.load %arg5[%c0_30, %c0_31] : memref<2x128xf32, #tpu.memory_space<vmem>>, vector<2x128xf32>
      tpu.vector_store %arg5[%c0_30, %c0_31], %44 {strides = array<i32>} : memref<2x128xf32, #tpu.memory_space<vmem>>, vector<2x128xf32>,
    } else {
    }
    %c0_25 = arith.constant 0 : index
    %c0_26 = arith.constant 0 : index
    %41 = vector.load %arg5[%c0_25, %c0_26] : memref<2x128xf32, #tpu.memory_space<vmem>>, vector<2x128xf32>
    %42 = arith.addf %41, %37 : vector<2x128xf32>
    %c0_27 = arith.constant 0 : index
    %c0_28 = arith.constant 0 : index
    %43 = vector.load %arg5[%c0_27, %c0_28] : memref<2x128xf32, #tpu.memory_space<vmem>>, vector<2x128xf32>
    tpu.vector_store %arg5[%c0_27, %c0_28], %42 {strides = array<i32>} : memref<2x128xf32, #tpu.memory_space<vmem>>, vector<2x128xf32>,
    return
  }
  func.func @transform_0(%arg0: i32) -> (i32, i32, i32) {
    %c0_i32 = arith.constant 0 : i32
    %c0_i32_0 = arith.constant 0 : i32
    %c0_i32_1 = arith.constant 0 : i32
    return %arg0, %c0_i32, %c0_i32_0 : i32, i32, i32
  }
  func.func @transform_1(%arg0: i32) -> (i32, i32, i32) {
    %c0_i32 = arith.constant 0 : i32
    %c0_i32_0 = arith.constant 0 : i32
    %c0_i32_1 = arith.constant 0 : i32
    %c0_i32_2 = arith.constant 0 : i32
    return %c0_i32, %c0_i32_0, %c0_i32_1 : i32, i32, i32
  }
  func.func @transform_2(%arg0: i32) -> (i32, i32) {
    %c0_i32 = arith.constant 0 : i32
    %c0_i32_0 = arith.constant 0 : i32
    %c0_i32_1 = arith.constant 0 : i32
    return %c0_i32, %c0_i32_0 : i32, i32
  }
  func.func @transform_3(%arg0: i32) -> (i32, i32) {
    %c0_i32 = arith.constant 0 : i32
    %c0_i32_0 = arith.constant 0 : i32
    return %arg0, %c0_i32 : i32, i32
  }
  func.func @transform_4(%arg0: i32) -> (i32, i32) {
    %c0_i32 = arith.constant 0 : i32
    %c0_i32_0 = arith.constant 0 : i32
    %c0_i32_1 = arith.constant 0 : i32
    return %c0_i32, %c0_i32_0 : i32, i32
  }
}

</mosaic_0001>

<bundles_post_ra>
// kernel: tpu_custom_call.1
= control target key start
LH: loop header
LB: loop body
LE: loop exit
PB: predicated region body
PF: predicated region fallthrough
CT: control target
= control target key end

     0   :  { %10 = vsyncpa [#allocation3], 0  ;;  %s1009_s0 = inlined_call_operand.vmem [shape: f32[2,20,80], index: 0, kind: input, shape index: {}]   ;;  %s1010_s1 = inlined_call_operand.hbm [shape: f32[5,80,128], index: 1, kind: input, shape index: {}]   ;;  %s1011_s2 = inlined_call_operand.vmem [shape: f32[1,128], index: 2, kind: input, shape index: {}]   ;;  %s1012_s3 = inlined_call_operand.hbm [shape: f32[32,128], index: 3, kind: output, shape index: {0}]   ;;  %s1013_s4 = inlined_call_operand.hbm [shape: f32[2,128], index: 4, kind: output, shape index: {1}]  }
   0x1   :  { %11 = vsyncpa [#allocation4], 0 }
   0x2   :  { %13 = vsyncpa [#allocation4 + $0x1], 0 }
   0x3   :  { %14 = vsyncpa [#allocation7], 0  ;;  %s850_s15 = smov 0   ;;  %s852_s16 = smov 0  }
   0x4   :  { %s854_s17 = smov 0   ;;  %s856_s18 = smov 0  }
   0x5 LB: > { %s871_s19 = sadd.s32 4294967295, %s816_s18   ;;  %s587_s20 = sadd.s32 4294967294, %s816_s18   ;;  %s816_s18 = sphi %s856_s18, %s1019_s18   ;;  %s812_s17 = sphi %s854_s17, %s1018_s17   ;;  %s808_s16 = sphi %s852_s16, %s1017_s16   ;;  %s804_s15 = sphi %s850_s15, %s1016_s15  }
   0x6   : > { %s875_s21 = sadd.s32 1, %s816_s18   ;;  %s95_s22 = sadd.s32 1, %s812_s17 }
   0x7   : > { %s92_s23 = ssub.s32 %s816_s18, %s875_s21  ;;  %p105_p0 = scmp.ne.s32.totalorder %s812_s17, %s808_s16 }
   0x8   : > { %p93_p1 = scmp.eq.s32.totalorder %s92_s23, 0  ;;  %p106_p2 = scmp.eq.s32.totalorder %s871_s19, 1 }
   0x9   : > { %p111_p3 = scmp.ne.s32.totalorder %s808_s16, %s804_s15  ;;  %p112_p4 = scmp.eq.s32.totalorder %s587_s20, 1 }
   0xa   : > { %s886_s24 = scalar_select %p93_p1, %s812_s17, %s95_s22  }
   0xb   : > { %p890_p5 = por %p106_p2, %p105_p0  ;;  %p894_p6 = por %p112_p4, %p111_p3 }
   0xc   : > { %p588_p7 = scmp.ge.s32.totalorder %s816_s18, 1  ;;  %p140_p8 = scmp.lt.s32.totalorder %s816_s18, 3 }
   0xd   : > { %p589_p9 = scmp.ne.s32.totalorder %s871_s19, 0  ;;  %p643_p10 = scmp.eq.s32.totalorder %s871_s19, 0 }
   0xe   : > { %p141_p11 = pnand %p588_p7, %p140_p8  ;;  %s151_s29 = sshll.u32 %s1010_s1, 4  ;;  %s152_s29 = int_to_ptr.hbm [resolvable:$true] %s151_s29 }
   0xf   : > { %s818_s30 = smov [#allocation2]   ;;  %s819_s6 = smov 128  }
  0x10   : > { %p635_p12 = pneg %p141_p11  ;;  %s153_s5 = sshll.u32 %s818_s30, 4  ;;  %s154_s5 = int_to_ptr.vmem [resolvable:$true] %s153_s5 }
  0x11   : > { %s820_s7 = smov 8   ;;  %180 = sbr.rel (%p141_p11) target bundleno = 234 (0xea), region = 32 }
  0x12   : > { %p636_p13 = pnand %p643_p10, %p635_p12 }
  0x14   : > { %638 = dma.hbm_to_vmem [thread:$0]  (!%p636_p13), %s152_s29, 6400, %s154_s5, [#allocation3], %s819_s6, %s819_s6, %s820_s7  }
  0x16   : > { %791 = dma.done.wait (%p643_p10), [#allocation3], 6400  }
  0x17   : > { %793 = vsyncadd (%p643_p10), [#allocation3], 4294960896  ;;  %p207_p0 = scmp.lt.s32.totalorder %s871_s19, 1  ;;  %v236_v0 = vld [vmem:[#allocation2 + $0x98] sm:$0xff]  ;;  %v225_v1 = vld [vmem:[#allocation2 + $0x48] sm:$0xff]  ;;  %vm312_vm0 = vcmask 1045504  }
  0x18   : > { %v311_v2 = vld [vmem:[#allocation2 + $0xe8] sm:$0xff]  ;;  %257 = vmatpush.msra.mxu0 %v236_v0  ;;  %284 = vmatpush.msra.mxu1 %v225_v1  ;;  %v235_v3 = vld [vmem:[#allocation2 + $0x90] sm:$0xff]  ;;  %v224_v4 = vld [vmem:[#allocation2 + $0x40] sm:$0xff]  ;;  %vm358_vm1 = vcmask 1044480   ;;  %vm246_vm2 = vcmask 654336   ;;  %vm240_vm3 = vcmask 1046528  }
  0x19   : > { %v310_v5 = vld [vmem:[#allocation2 + $0xe0] sm:$0xff]  ;;  %328 = vmatpush.msra.mxu2 %v311_v2  ;;  %v357_v6 = vld [vmem:[#allocation2 + $0x138] sm:$0xff]  ;;  %v234_v7 = vld [vmem:[#allocation2 + $0x88] sm:$0xff]  ;;  %s913_s8 = scalar_select %p207_p0, %s871_s19, 1  ;;  %vm404_vm4 = vcmask 1043456   ;;  %vm463_vm5 = vcmask 1040384  }
  0x1a   : > { %v223_v8 = vld [vmem:[#allocation2 + $0x38] sm:$0xff]  ;;  %258 = vmatpush.msra.mxu0 %v235_v3  ;;  %285 = vmatpush.msra.mxu1 %v224_v4  ;;  %v356_v10 = vld [vmem:[#allocation2 + $0x130] sm:$0xff]  ;;  %v233_v11 = vld [vmem:[#allocation2 + $0x80] sm:$0xff]  ;;  %s202_s13 = sand.u32 1, %s808_s16  }
  0x1b   : > { %v309_v9 = vld [vmem:[#allocation2 + $0xd8] sm:$0xff]  ;;  %329 = vmatpush.msra.mxu2 %v310_v5  ;;  %374 = vmatpush.msra.mxu3 %v357_v6  ;;  %v222_v12 = vld [vmem:[#allocation2 + $0x30] sm:$0xff]  ;;  %v355_v14 = vld [vmem:[#allocation2 + $0x128] sm:$0xff]  ;;  %s624_s9 = smul.u32 24, %s913_s8  ;;  %s593_s14 = sshll.u32 %s202_s13, 4 }
  0x1c   : > { %259 = vmatpush.msra.mxu0 %v234_v7  ;;  %286 = vmatpush.msra.mxu1 %v223_v8  ;;  %v308_v13 = vld [vmem:[#allocation2 + $0xd0] sm:$0xff]  ;;  %v232_v15 = vld [vmem:[#allocation2 + $0x78] sm:$0xff]  ;;  %v221_v16 = vld [vmem:[#allocation2 + $0x28] sm:$0xff]  ;;  %s960_s23 = scalar_lea.vmem [#allocation5], %s593_s14 }
  0x1d   : > { %330 = vmatpush.msra.mxu2 %v309_v9  ;;  %375 = vmatpush.msra.mxu3 %v356_v10  ;;  %v307_v17 = vld [vmem:[#allocation2 + $0xc8] sm:$0xff]  ;;  %v354_v18 = vld [vmem:[#allocation2 + $0x120] sm:$0xff]  ;;  %v231_v19 = vld [vmem:[#allocation2 + $0x70] sm:$0xff]  ;;  %s919_s12 = scalar_lea.vmem %s1009_s0, %s624_s9 }
  0x1e   : > { %260 = vmatpush.msra.mxu0 %v233_v11  ;;  %287 = vmatpush.msra.mxu1 %v222_v12  ;;  %v220_v20 = vld [vmem:[#allocation2 + $0x20] sm:$0xff]  ;;  %v353_v22 = vld [vmem:[#allocation2 + $0x118] sm:$0xff]  ;;  %v230_v23 = vld [vmem:[#allocation2 + $0x68] sm:$0xff] }
  0x1f   : > { %331 = vmatpush.msra.mxu2 %v308_v13  ;;  %376 = vmatpush.msra.mxu3 %v355_v14  ;;  %v306_v21 = vld [vmem:[#allocation2 + $0xc0] sm:$0xff]  ;;  %v219_v24 = vld [vmem:[#allocation2 + $0x18] sm:$0xff]  ;;  %v352_v26 = vld [vmem:[#allocation2 + $0x110] sm:$0xff] }
  0x20   : > { %261 = vmatpush.msra.mxu0 %v232_v15  ;;  %288 = vmatpush.msra.mxu1 %v221_v16  ;;  %v305_v25 = vld [vmem:[#allocation2 + $0xb8] sm:$0xff]  ;;  %v229_v27 = vld [vmem:[#allocation2 + $0x60] sm:$0xff]  ;;  %v218_v28 = vld [vmem:[#allocation2 + $0x10] sm:$0xff] }
  0x21   : > { %332 = vmatpush.msra.mxu2 %v307_v17  ;;  %377 = vmatpush.msra.mxu3 %v354_v18  ;;  %v304_v29 = vld [vmem:[#allocation2 + $0xb0] sm:$0xff]  ;;  %v351_v30 = vld [vmem:[#allocation2 + $0x108] sm:$0xff]  ;;  %v922_v31 = vld [vmem:[%s919_s12] sm:$0xff] }
  0x22   : > { %262 = vmatpush.msra.mxu0 %v231_v19  ;;  %289 = vmatpush.msra.mxu1 %v220_v20  ;;  %v925_v32 = vld [vmem:[%s919_s12 + $0x8] sm:$0xff]  ;;  %v228_v33 = vld [vmem:[#allocation2 + $0x58] sm:$0xff]  ;;  %v313_v35 = vrot.slane %v922_v31, 2  ;;  %v350_v38 = vld [vmem:[#allocation2 + $0x100] sm:$0xff]  ;;  %v359_v41 = vrot.slane %v922_v31, 3  ;;  %v241_v45 = vrot.slane %v922_v31, 1 }
  0x23   : > { %333 = vmatpush.msra.mxu2 %v306_v21  ;;  %378 = vmatpush.msra.mxu3 %v353_v22  ;;  %v217_v34 = vld [vmem:[#allocation2 + $0x8] sm:$0xff]  ;;  %v314_v36 = vrot.slane %v925_v32, 2  ;;  %v227_v39 = vld [vmem:[#allocation2 + $0x50] sm:$0xff]  ;;  %v216_v40 = vld [vmem:[#allocation2] sm:$0xff]  ;;  %v360_v42 = vrot.slane %v925_v32, 3  ;;  %v242_v46 = vrot.slane %v925_v32, 1 }
  0x24   : > { %263 = vmatpush.msra.mxu0 %v230_v23  ;;  %290 = vmatpush.msra.mxu1 %v219_v24  ;;  %v303_v37 = vld [vmem:[#allocation2 + $0xa8] sm:$0xff]  ;;  %v302_v43 = vld [vmem:[#allocation2 + $0xa0] sm:$0xff]  ;;  %v349_v44 = vld [vmem:[#allocation2 + $0xf8] sm:$0xff]  ;;  %v405_v2 = vrot.slane %v922_v31, 4  ;;  %v406_v3 = vrot.slane %v925_v32, 4 }
  0x25   : > { %334 = vmatpush.msra.mxu2 %v305_v25  ;;  %379 = vmatpush.msra.mxu3 %v352_v26  ;;  %v315_v47 = vsel %vm312_vm0, %v313_v35, %v314_v36  ;;  %v403_v48 = vld [vmem:[#allocation2 + $0x188] sm:$0xff]  ;;  %v348_v49 = vld [vmem:[#allocation2 + $0xf0] sm:$0xff]  ;;  %v361_v51 = vsel %vm358_vm1, %v359_v41, %v360_v42  ;;  %v402_v52 = vld [vmem:[#allocation2 + $0x180] sm:$0xff]  ;;  %v243_v53 = vsel %vm240_vm3, %v241_v45, %v242_v46 }
  0x26   : > { %264 = vmatpush.msra.mxu0 %v229_v27  ;;  %291 = vmatpush.msra.mxu1 %v218_v28  ;;  %v215_v50 = vld [vmem:[%s919_s12 + $0x10] sm:$0xf]  ;;  %v401_v54 = vld [vmem:[#allocation2 + $0x178] sm:$0xff]  ;;  %v399_v60 = vld [vmem:[#allocation2 + $0x168] sm:$0xff]  ;;  %v407_v7 = vsel %vm404_vm4, %v405_v2, %v406_v3 }
  0x27   : > { %335 = vmatpush.msra.mxu2 %v304_v29  ;;  %380 = vmatpush.msra.mxu3 %v351_v30  ;;  %v316_v55 = vrot.slane %v215_v50, 2  ;;  %v400_v56 = vld [vmem:[#allocation2 + $0x170] sm:$0xff]  ;;  %v362_v57 = vrot.slane %v215_v50, 3  ;;  %v244_v58 = vrot.slane %v215_v50, 1  ;;  %v398_v62 = vld [vmem:[#allocation2 + $0x160] sm:$0xff]  ;;  %v397_v0 = vld [vmem:[#allocation2 + $0x158] sm:$0xff] }
  0x28   : > { %265 = vmatpush.msra.mxu0 %v228_v33  ;;  %292 = vmatpush.msra.mxu1 %v217_v34  ;;  %v396_v1 = vld [vmem:[#allocation2 + $0x150] sm:$0xff]  ;;  %v395_v4 = vld [vmem:[#allocation2 + $0x148] sm:$0xff]  ;;  %v408_v5 = vrot.slane %v215_v50, 4  ;;  %v394_v6 = vld [vmem:[#allocation2 + $0x140] sm:$0xff] }
  0x29   : > { %336 = vmatpush.msra.mxu2 %v303_v37  ;;  %381 = vmatpush.msra.mxu3 %v350_v38  ;;  %v317_v59 = vsel %vm312_vm0, %v314_v36, %v316_v55  ;;  %v363_v61 = vsel %vm358_vm1, %v360_v42, %v362_v57  ;;  %v245_v63 = vsel %vm240_vm3, %v242_v46, %v244_v58  ;;  %v687_v23 = vld [vmem:[%s1011_s2] ss:$0 sm:$0xff] }
  0x2a   : > { %266 = vmatpush.msra.mxu0 %v227_v39  ;;  %293 = vmatpush.msra.mxu1 %v216_v40  ;;  %v409_v8 = vsel %vm404_vm4, %v406_v3, %v408_v5 }
  0x2b   : > { %337 = vmatpush.msra.mxu2 %v302_v43  ;;  %382 = vmatpush.msra.mxu3 %v349_v44 }
  0x2c   : > { %599 = vmatmul.msk.f32.vlgmr.msra.gmra.mxu2 %vm246_vm2, %v315_v47  ;;  %420 = vmatpush.msrb.mxu0 %v403_v48 }
  0x2d   : > { %614 = vmatpush.msrb.mxu1 %v403_v48  ;;  %383 = vmatpush.msra.mxu3 %v348_v49 }
  0x2e   : > { %601 = vmatmul.msk.f32.vlgmr.msra.gmra.mxu3 %vm246_vm2, %v361_v51  ;;  %421 = vmatpush.msrb.mxu0 %v402_v52 }
  0x2f   : > { %615 = vmatpush.msrb.mxu1 %v402_v52  ;;  %595 = vmatmul.msk.f32.vlgmr.msra.gmra.mxu0 %vm246_vm2, %v243_v53 }
  0x30   : > { %597 = vmatmul.msk.f32.vlgmr.msra.gmra.mxu1 %vm246_vm2, %v922_v31  ;;  %422 = vmatpush.msrb.mxu0 %v401_v54 }
  0x31   : > { %616 = vmatpush.msrb.mxu1 %v401_v54 }
  0x32   : > { %423 = vmatpush.msrb.mxu0 %v400_v56 }
  0x33   : > { %617 = vmatpush.msrb.mxu1 %v400_v56 }
  0x34   : > { %600 = vmatmul.msk.f32.gmra.mxu2 %vm246_vm2, %v317_v59  ;;  %424 = vmatpush.msrb.mxu0 %v399_v60 }
  0x35   : > { %618 = vmatpush.msrb.mxu1 %v399_v60 }
  0x36   : > { %602 = vmatmul.msk.f32.gmra.mxu3 %vm246_vm2, %v363_v61  ;;  %425 = vmatpush.msrb.mxu0 %v398_v62 }
  0x37   : > { %619 = vmatpush.msrb.mxu1 %v398_v62  ;;  %596 = vmatmul.msk.f32.gmra.mxu0 %vm246_vm2, %v245_v63 }
  0x38   : > { %598 = vmatmul.msk.f32.gmra.mxu1 %vm246_vm2, %v925_v32  ;;  %426 = vmatpush.msrb.mxu0 %v397_v0 }
  0x39   : > { %620 = vmatpush.msrb.mxu1 %v397_v0 }
  0x3a   : > { %427 = vmatpush.msrb.mxu0 %v396_v1 }
  0x3b   : > { %621 = vmatpush.msrb.mxu1 %v396_v1 }
  0x3c   : > { %428 = vmatpush.msrb.mxu0 %v395_v4 }
  0x3d   : > { %622 = vmatpush.msrb.mxu1 %v395_v4 }
  0x3e   : > { %429 = vmatpush.msrb.mxu0 %v394_v6 }
  0x3f   : > { %623 = vmatpush.msrb.mxu1 %v394_v6  ;;  %603 = vmatmul.msk.f32.vlgmr.msrb.gmra.mxu0 %vm246_vm2, %v407_v7 }
  0x40   : > { %604 = vmatmul.msk.f32.vlgmr.msrb.gmra.mxu1 %vm246_vm2, %v409_v8 }
  0xac   : > { %v268_v9 = vpop.f32.mrf.mxu0 }
  0xad   : > { %v295_v10 = vpop.f32.mrf.mxu1 }
  0xae   : > { %v296_v13 = vadd.f32 %v295_v10, %v268_v9 }
  0xaf   : > { %v339_v11 = vpop.f32.mrf.mxu2 }
  0xb0   : > { %v345_v17 = vadd.f32 %v339_v11, %v296_v13 }
  0xb1   : > { %v385_v12 = vpop.f32.mrf.mxu3 }
  0xb2   : > { %v391_v22 = vadd.f32 %v385_v12, %v345_v17 }
  0xb4   : > { %v271_v14 = vpop.f32.mrf.mxu0 }
  0xb5   : > { %v298_v15 = vpop.f32.mrf.mxu1 }
  0xb6   : > { %v299_v16 = vadd.f32 %v298_v15, %v271_v14 }
  0xb7   : > { %v342_v18 = vpop.f32.mrf.mxu2 }
  0xb8   : > { %v346_v19 = vadd.f32 %v342_v18, %v299_v16 }
  0xb9   : > { %v388_v20 = vpop.f32.mrf.mxu3 }
  0xba   : > { %v392_v21 = vadd.f32 %v388_v20, %v346_v19 }
  0xbc   : > { %v431_v24 = vpop.f32.mrf.mxu0 }
  0xbd   : > { %v437_v25 = vadd.f32 %v431_v24, %v391_v22  ;;  %v434_v26 = vpop.f32.mrf.mxu1 }
  0xbe   : > { %v438_v27 = vadd.f32 %v434_v26, %v392_v21 }
  0xbf   : > { %v443_v28 = vadd.f32 %v687_v23, %v437_v25 }
  0xc0   : > { %v444_v29 = vadd.f32 %v687_v23, %v438_v27 }
  0xc1   : > { %445 = vst [vmem:[%s960_s23] sm:$0xff] %v443_v28  ;;  %v454_v30 = vmul.f32 %v443_v28, %v443_v28 }
  0xc2   : > { %446 = vst [vmem:[%s960_s23 + $0x8] sm:$0xff] %v444_v29  ;;  %v447_v31 = vadd.f32 %v444_v29, %v443_v28  ;;  %v455_v32 = vmul.f32 %v444_v29, %v444_v29 }
  0xc4   : > { %v448_v33 = vrot.slane %v447_v31, 4  ;;  %v456_v34 = vadd.f32 %v455_v32, %v454_v30 }
  0xc6   : > { %v449_v35 = vadd.f32 %v448_v33, %v447_v31  ;;  %v457_v36 = vrot.slane %v456_v34, 4 }
  0xc8   : > { %v450_v37 = vrot.slane %v449_v35, 2  ;;  %v458_v38 = vadd.f32 %v457_v36, %v456_v34 }
  0xca   : > { %v451_v39 = vadd.f32 %v450_v37, %v449_v35  ;;  %v459_v40 = vrot.slane %v458_v38, 2 }
  0xcc   : > { %v452_v41 = vrot.slane %v451_v39, 1  ;;  %v460_v42 = vadd.f32 %v459_v40, %v458_v38 }
  0xce   : > { %v461_v43 = vrot.slane %v460_v42, 1  ;;  %v453_v44 = vadd.f32 %v452_v41, %v451_v39  ;;  %468 = sbr.rel (%p589_p9) target bundleno = 213 (0xd5), region = 40 }
  0xd0   : > { %v462_v45 = vadd.f32 %v461_v43, %v460_v42 }
  0xd2   : > { %v464_v46 = vsel %vm463_vm5, %v453_v44, %v462_v45 }
  0xd3   : > { %v821_v47 = vmov 0.0  }
  0xd4   : > { %469 = vst [vmem:[#allocation6] sm:$0x3] %v821_v47 }
  0xd5 PF: > { %s613_s27 = sshll.u32 %s871_s19, 4  ;;  %s486_s5 = sshll.u32 %s960_s23, 4  ;;  %s487_s5 = int_to_ptr.vmem [resolvable:$true] %s486_s5 }
  0xd6   : > { %s485_s30 = scalar_lea.hbm %s1012_s3, %s613_s27  ;;  %s474_s7 = scalar_lea.sflag [#allocation4], %s202_s13 }
  0xd7   : > { %s488_s6 = sshll.u32 %s485_s30, 4  ;;  %s738_s12 = scalar_lea.hbm %s1012_s3, 32  ;;  %s489_s6 = int_to_ptr.hbm [resolvable:$true] %s488_s6 }
  0xd8   : > { %s732_s8 = sshra.s32 %s489_s6, 4  ;;  %s733_s8 = int_to_ptr.hbm [resolvable:$true] %s732_s8 }
  0xd9   : > { %s734_s9 = scalar_lea.hbm %s733_s8, 16  ;;  %p739_p7 = scmp.lt.s32.totalorder %s733_s8, %s1012_s3 }
  0xda   : > { %p735_p1 = scmp.ne.s32.totalorder %s733_s8, %s734_s9  ;;  %p740_p8 = scmp.lt.s32.totalorder %s738_s12, %s734_s9 }
  0xdb   : > { %v470_v48 = vld [vmem:[#allocation6] sm:$0x3] }
  0xdc   : > { %v471_v49 = vadd.f32 %v470_v48, %v464_v46  ;;  %p736_p3 = pnand %p735_p1, %p890_p5  ;;  %p741_p9 = por %p740_p8, %p739_p7 }
  0xde   : > { %472 = vst [vmem:[#allocation6] sm:$0x3] %v471_v49  ;;  %p737_p4 = pneg %p736_p3 }
  0xe0   : > { %p742_p10 = pnand %p741_p9, %p737_p4 }
  0xe2   : > { %745 = shalt.err (!%p742_p10)
}
  0xe3   : > { %s822_s13 = smov 128   ;;  %s823_s22 = smov 8  }
  0xe4   : > { %629 = dma.vmem_to_hbm [thread:$0]  (%p890_p5), %s487_s5, 256, %s489_s6, %s474_s7, %s822_s13, %s822_s13, %s823_s22  }
  0xe5   : > { %s503_s28 = sshll.u32 %s1013_s4, 4  ;;  %s824_s29 = smov [#allocation6]   ;;  %s504_s28 = int_to_ptr.hbm [resolvable:$true] %s503_s28 }
  0xe6   : > { %s501_s30 = sshll.u32 %s824_s29, 4  ;;  %s502_s30 = int_to_ptr.vmem [resolvable:$true] %s501_s30 }
  0xe7   : > { %631 = dma.vmem_to_hbm [thread:$0]  (%p106_p2), %s502_s30, 32, %s504_s28, [#allocation7]  }
  0xe8   : > { %795 = dma.done.wait (%p106_p2), [#allocation7], 32  }
  0xe9   : > { %797 = vsyncadd (%p106_p2), [#allocation7], 4294967264 }
  0xea PF: > { %p647_p5 = scmp.ge.s32.totalorder %s816_s18, 2  ;;  %s520_s25 = sand.u32 1, %s804_s15  }
  0xeb   : > { %s521_s5 = scalar_lea.sflag [#allocation4], %s520_s25 }
  0xec   : > { %p640_p11 = pnand %p647_p5, %p894_p6 }
  0xee   : > { %p641_p12 = pneg %p640_p11 }
  0xf0   : > { %799 = dma.done.wait (%p641_p12), %s521_s5, 256  }
  0xf1   : > { %801 = vsyncadd (%p641_p12), %s521_s5, 4294967040  ;;  %p17_p13 = scmp.ge.s32.totalorder %s875_s21, 4   ;;  %s1016_s15 = smov %s808_s16 }
  0xf2   : > { %s1017_s16 = smov %s812_s17  ;;  %s1018_s17 = smov %s886_s24 }
  0xf3   : > { %s1019_s18 = smov %s875_s21  ;;  %19 = sbr.rel (!%p17_p13) target bundleno = 5 (0x5), region = 88 }
  0xf8   :  { %527 = vsyncpa [#allocation3], 1 }
  0xf9   :  { %529 = vsyncpa [#allocation3 + $0x1], 1 }
  0xfa   :  { %530 = vsyncpa [#allocation4], 1 }
  0xfb   :  { %532 = vsyncpa [#allocation4 + $0x1], 1 }
  0xfc   :  { %533 = vsyncpa [#allocation7], 1 }

</bundles_post_ra>
